<compile_context>
chip_gen: v7x
topology: tpu7x:2x2x1
jax: 0.10.0
libtpu: 0.0.40
codegen_flags: <defaults>
</compile_context>

<pallas_src>
import jax
import jax.numpy as jnp
from jax.experimental import pallas as pl
from jax.experimental.pallas import tpu as pltpu

INPUT_DIM = 784
HIDDEN_DIM = 256
LATENT_DIM = 2
MAX_TILE_B = 1024      # f32 x tile @ TB=1024 is ~3.2 MiB (x2 buffers) -> far under VMEM limits


def _round_up(n, m):
    return (n + m - 1) // m * m


def encoder_kernel(x_ref, w1_ref, b1_ref, w2_ref, b2_ref, o_ref):
    # x_ref:  (TB, 784) f32    w1_ref: (784, 256) bf16   b1_ref: (1, 256) f32
    # w2_ref: (256, 2)  bf16   b2_ref: (1, 2)    f32     o_ref:  (TB, 2)  f32
    x_bf16 = x_ref[...].astype(jnp.bfloat16)                   # cast in-kernel (cheap VPU work)
    h = jnp.dot(x_bf16, w1_ref[...], preferred_element_type=jnp.float32)
    h = jnp.maximum(h + b1_ref[...], 0.0)                      # bias + ReLU in f32 (VPU-safe on v5e)
    y = jnp.dot(h.astype(jnp.bfloat16), w2_ref[...],
                preferred_element_type=jnp.float32)            # narrow N=2 matmul (~12% of FLOPs)
    o_ref[...] = y + b2_ref[...]


def encoder_forward(x, w1, b1, w2, b2):
    """x: (B, 784) f32; w1: (784, 256); b1: (256,); w2: (256, 2); b2: (2,). Returns (B, 2) f32."""
    B = x.shape[0]
    # Batch tile: multiple of 8 (sublane); aim for >=2 grid steps (both TCs on v7x), cap for huge B.
    TB = min(MAX_TILE_B, max(8, _round_up(pl.cdiv(B, 2), 8)))
    grid = (pl.cdiv(B, TB),)   # trailing partial block handled by masked edge stores

    # One-time, small weight/bias prep; these stay resident in VMEM (constant index_maps).
    w1b = w1.astype(jnp.bfloat16)
    b1r = b1.reshape(1, HIDDEN_DIM).astype(jnp.float32)
    w2b = w2.astype(jnp.bfloat16)
    b2r = b2.reshape(1, LATENT_DIM).astype(jnp.float32)

    cost = pl.CostEstimate(
        flops=2 * B * (INPUT_DIM * HIDDEN_DIM + HIDDEN_DIM * LATENT_DIM),
        transcendentals=0,
        bytes_accessed=(x.size * 4 + w1b.size * 2 + w2b.size * 2
                        + b1r.size * 4 + b2r.size * 4 + B * LATENT_DIM * 4),
    )

    out = pl.pallas_call(
        encoder_kernel,
        out_shape=jax.ShapeDtypeStruct((B, LATENT_DIM), jnp.float32),
        grid_spec=pltpu.PrefetchScalarGridSpec(
            num_scalar_prefetch=0,
            grid=grid,
            in_specs=[
                # x streams over the batch; last dim == full array dim satisfies (8,128).
                pl.BlockSpec((TB, INPUT_DIM), lambda i: (i, 0)),
                # Weights/biases: constant index_maps -> resident in VMEM across grid steps.
                pl.BlockSpec((INPUT_DIM, HIDDEN_DIM), lambda i: (0, 0)),
                pl.BlockSpec((1, HIDDEN_DIM), lambda i: (0, 0)),
                pl.BlockSpec((HIDDEN_DIM, LATENT_DIM), lambda i: (0, 0)),
                pl.BlockSpec((1, LATENT_DIM), lambda i: (0, 0)),
            ],
            out_specs=pl.BlockSpec((TB, LATENT_DIM), lambda i: (i, 0)),
        ),
        compiler_params=pltpu.CompilerParams(
            dimension_semantics=("parallel",),       # shard batch tiles across TCs on v7x
            vmem_limit_bytes=32 * 1024 * 1024,
        ),
        cost_estimate=cost,
    )(x.astype(jnp.float32), w1b, b1r, w2b, b2r)

    return out


def init_params(key):
    # Deterministic init mirroring nn.Linear's Kaiming-uniform-ish bounds.
    k1, k2, k3, k4 = jax.random.split(key, 4)
    bound1 = 1.0 / (INPUT_DIM ** 0.5)
    bound2 = 1.0 / (HIDDEN_DIM ** 0.5)
    w1 = jax.random.uniform(k1, (INPUT_DIM, HIDDEN_DIM), jnp.float32, -bound1, bound1)
    b1 = jax.random.uniform(k2, (HIDDEN_DIM,), jnp.float32, -bound1, bound1)
    w2 = jax.random.uniform(k3, (HIDDEN_DIM, LATENT_DIM), jnp.float32, -bound2, bound2)
    b2 = jax.random.uniform(k4, (LATENT_DIM,), jnp.float32, -bound2, bound2)
    return w1, b1, w2, b2


if __name__ == "__main__":
    key = jax.random.PRNGKey(0)
    kx, kp = jax.random.split(key)

    B = 8  # small batch for the smoke test; the kernel tiles any B (partial blocks masked)
    x = jax.random.normal(kx, (B, INPUT_DIM), dtype=jnp.float32)
    w1, b1, w2, b2 = init_params(kp)

    out = jax.block_until_ready(encoder_forward(x, w1, b1, w2, b2))
    assert out.shape == (B, LATENT_DIM)

    # Reference matching the kernel's bf16-matmul / f32-accumulate numerics.
    h_ref = jnp.maximum(
        jnp.dot(x.astype(jnp.bfloat16), w1.astype(jnp.bfloat16),
                preferred_element_type=jnp.float32) + b1, 0.0)
    ref = jnp.dot(h_ref.astype(jnp.bfloat16), w2.astype(jnp.bfloat16),
                  preferred_element_type=jnp.float32) + b2
    assert jnp.allclose(out, ref, atol=2e-2, rtol=2e-2), \
        f"max abs err vs bf16 ref: {jnp.max(jnp.abs(out - ref))}"

    # Looser sanity check against the pure-f32 module semantics.
    # TODO(synk): kernel uses bf16 MXU inputs; keep matmuls in f32 if strict f32 parity is required.
    ref_f32 = jnp.maximum(x @ w1 + b1, 0.0) @ w2 + b2
    assert jnp.allclose(out, ref_f32, atol=5e-2, rtol=5e-2), \
        f"max abs err vs f32 ref: {jnp.max(jnp.abs(out - ref_f32))}"

    print("KERNEL_OK")
</pallas_src>

<mosaic_0001>
module attributes {stable_mosaic.version = 11 : i64} {
  func.func @encoder_kernel(%arg0: i32, %arg1: memref<8x784xf32, #tpu.memory_space<vmem>>, %arg2: memref<784x256xbf16, #tpu.memory_space<vmem>>, %arg3: memref<1x256xf32, #tpu.memory_space<vmem>>, %arg4: memref<256x2xbf16, #tpu.memory_space<vmem>>, %arg5: memref<1x2xf32, #tpu.memory_space<vmem>>, %arg6: memref<8x2xf32, #tpu.memory_space<vmem>>) attributes {dimension_semantics = [#tpu.dimension_semantics<parallel>], iteration_bounds = array<i64: 1>, scalar_prefetch = 0 : i64, scratch_operands = 0 : i64, tpu.core_type = #tpu.core_type<tc>, window_params = [{transform_indices = @transform_0, window_bounds = array<i64: 8, 784>}, {pipeline_mode = #tpu.pipeline_mode<synchronous>, transform_indices = @transform_1, window_bounds = array<i64: 784, 256>}, {pipeline_mode = #tpu.pipeline_mode<synchronous>, transform_indices = @transform_2, window_bounds = array<i64: 1, 256>}, {pipeline_mode = #tpu.pipeline_mode<synchronous>, transform_indices = @transform_3, window_bounds = array<i64: 256, 2>}, {pipeline_mode = #tpu.pipeline_mode<synchronous>, transform_indices = @transform_4, window_bounds = array<i64: 1, 2>}, {transform_indices = @transform_5, window_bounds = array<i64: 8, 2>}]} {
    %c0 = arith.constant 0 : index
    %c0_0 = arith.constant 0 : index
    %0 = vector.load %arg1[%c0, %c0_0] : memref<8x784xf32, #tpu.memory_space<vmem>>, vector<8x784xf32>
    %1 = arith.truncf %0 : vector<8x784xf32> to vector<8x784xbf16>
    %c0_1 = arith.constant 0 : index
    %c0_2 = arith.constant 0 : index
    %2 = vector.load %arg2[%c0_1, %c0_2] : memref<784x256xbf16, #tpu.memory_space<vmem>>, vector<784x256xbf16>
    %cst = arith.constant dense<0.000000e+00> : vector<8x256xf32>
    %3 = tpu.matmul %1, %2, %cst {dimension_numbers = #tpu.dot_dimension_numbers<[1], [0], [0], [1], [0, 0, 1, 1], [], []>} : vector<8x784xbf16>, vector<784x256xbf16>, vector<8x256xf32> -> vector<8x256xf32>
    %c0_3 = arith.constant 0 : index
    %c0_4 = arith.constant 0 : index
    %4 = vector.load %arg3[%c0_3, %c0_4] : memref<1x256xf32, #tpu.memory_space<vmem>>, vector<1x256xf32>
    %5 = vector.broadcast %4 : vector<1x256xf32> to vector<8x256xf32>
    %6 = arith.addf %3, %5 : vector<8x256xf32>
    %cst_5 = arith.constant 0.000000e+00 : f32
    %7 = vector.broadcast %cst_5 : f32 to vector<8x256xf32>
    %8 = arith.maximumf %6, %7 : vector<8x256xf32>
    %9 = arith.truncf %8 : vector<8x256xf32> to vector<8x256xbf16>
    %c0_6 = arith.constant 0 : index
    %c0_7 = arith.constant 0 : index
    %10 = vector.load %arg4[%c0_6, %c0_7] : memref<256x2xbf16, #tpu.memory_space<vmem>>, vector<256x2xbf16>
    %cst_8 = arith.constant dense<0.000000e+00> : vector<8x2xf32>
    %11 = tpu.matmul %9, %10, %cst_8 {dimension_numbers = #tpu.dot_dimension_numbers<[1], [0], [0], [1], [0, 0, 1, 1], [], []>} : vector<8x256xbf16>, vector<256x2xbf16>, vector<8x2xf32> -> vector<8x2xf32>
    %c0_9 = arith.constant 0 : index
    %c0_10 = arith.constant 0 : index
    %12 = vector.load %arg5[%c0_9, %c0_10] : memref<1x2xf32, #tpu.memory_space<vmem>>, vector<1x2xf32>
    %13 = vector.broadcast %12 : vector<1x2xf32> to vector<8x2xf32>
    %14 = arith.addf %11, %13 : vector<8x2xf32>
    %c0_11 = arith.constant 0 : index
    %c0_12 = arith.constant 0 : index
    %15 = vector.load %arg6[%c0_11, %c0_12] : memref<8x2xf32, #tpu.memory_space<vmem>>, vector<8x2xf32>
    tpu.vector_store %arg6[%c0_11, %c0_12], %14 {strides = array<i32>} : memref<8x2xf32, #tpu.memory_space<vmem>>, vector<8x2xf32>,
    return
  }
  func.func @transform_0(%arg0: i32) -> (i32, i32) {
    %c0_i32 = arith.constant 0 : i32
    %c0_i32_0 = arith.constant 0 : i32
    return %arg0, %c0_i32 : i32, i32
  }
  func.func @transform_1(%arg0: i32) -> (i32, i32) {
    %c0_i32 = arith.constant 0 : i32
    %c0_i32_0 = arith.constant 0 : i32
    %c0_i32_1 = arith.constant 0 : i32
    return %c0_i32, %c0_i32_0 : i32, i32
  }
  func.func @transform_2(%arg0: i32) -> (i32, i32) {
    %c0_i32 = arith.constant 0 : i32
    %c0_i32_0 = arith.constant 0 : i32
    %c0_i32_1 = arith.constant 0 : i32
    return %c0_i32, %c0_i32_0 : i32, i32
  }
  func.func @transform_3(%arg0: i32) -> (i32, i32) {
    %c0_i32 = arith.constant 0 : i32
    %c0_i32_0 = arith.constant 0 : i32
    %c0_i32_1 = arith.constant 0 : i32
    return %c0_i32, %c0_i32_0 : i32, i32
  }
  func.func @transform_4(%arg0: i32) -> (i32, i32) {
    %c0_i32 = arith.constant 0 : i32
    %c0_i32_0 = arith.constant 0 : i32
    %c0_i32_1 = arith.constant 0 : i32
    return %c0_i32, %c0_i32_0 : i32, i32
  }
  func.func @transform_5(%arg0: i32) -> (i32, i32) {
    %c0_i32 = arith.constant 0 : i32
    %c0_i32_0 = arith.constant 0 : i32
    return %arg0, %c0_i32 : i32, i32
  }
}

</mosaic_0001>

<bundles_post_ra>
// kernel: tpu_custom_call.1
= control target key start
LH: loop header
LB: loop body
LE: loop exit
PB: predicated region body
PF: predicated region fallthrough
CT: control target
= control target key end

     0   :  { %10 = vsyncpa [#allocation3], 0  ;;  %s1342_s18 = smov [#allocation2]   ;;  %s1466_s0 = inlined_call_operand.vmem [shape: f32[8,784], index: 0, kind: input, shape index: {}]   ;;  %s1467_s1 = inlined_call_operand.hbm [shape: bf16[784,256], index: 1, kind: input, shape index: {}]   ;;  %s1468_s2 = inlined_call_operand.vmem [shape: f32[1,256], index: 2, kind: input, shape index: {}]   ;;  %s1469_s3 = inlined_call_operand.vmem [shape: bf16[256,2], index: 3, kind: input, shape index: {}]   ;;  %s1470_s4 = inlined_call_operand.vmem [shape: f32[1,2], index: 4, kind: input, shape index: {}]   ;;  %s1471_s5 = inlined_call_operand.vmem [shape: f32[8,2], index: 5, kind: output, shape index: {}]  }
   0x1   :  { %s18_s19 = sshll.u32 %s1342_s18, 4  ;;  %s1318_s22 = scalar_lea.hbm %s1467_s1, 12544  ;;  %s19_s19 = int_to_ptr.vmem [resolvable:$true] %s18_s19 }
   0x2   :  { %p1319_p0 = scmp.ne.s32.totalorder %s1467_s1, %s1318_s22  ;;  %p1322_p1 = scmp.lt.u32.totalorder %s1318_s22, %s1467_s1 }
   0x4   :  { %p1324_p2 = pnand %p1322_p1, %p1319_p0 }
   0x6   :  { %1327 = shalt.err (!%p1324_p2)
}
   0x7   :  { %s1328_s27 = scalar_lea.vmem %s19_s19, 12544  ;;  %p1333_p4 = scmp.lt.s32.totalorder %s19_s19, %s19_s19 }
   0x8   :  { %p1329_p3 = scmp.ne.s32.totalorder %s19_s19, %s1328_s27  ;;  %p1334_p5 = scmp.lt.s32.totalorder %s1328_s27, %s1328_s27 }
   0xa   :  { %p1335_p6 = por %p1334_p5, %p1333_p4 }
   0xc   :  { %p1336_p7 = pnand %p1335_p6, %p1329_p3 }
   0xe   :  { %1339 = shalt.err (!%p1336_p7)
}
   0xf   :  { %s1343_s28 = smov 128   ;;  %s1344_s29 = smov 8  }
  0x10   :  { %24 = dma.hbm_to_vmem [thread:$0]  %s1467_s1, 12544, %s19_s19, [#allocation3], %s1343_s28, %s1343_s28, %s1344_s29  }
  0x11   :  { %1340 = dma.done.wait [#allocation3], 12544  }
  0x12   :  { %1341 = vsyncadd [#allocation3], 4294954752  ;;  %v1155_v0 = vld [vmem:[#allocation2 + $0x104] ss:$8 sps:$4 sm:$0xff]   ;;  %v1157_v1 = vld [vmem:[#allocation2 + $0x100] ss:$8 sps:$4 sm:$0xff]  }
  0x13   :  { %694 = vmatprep.subr.bf16.mxu0 %v1155_v0  ;;  %v1158_v2 = vld [vmem:[#allocation2 + $0x114] ss:$8 sps:$4 sm:$0xff]   ;;  %v1160_v3 = vld [vmem:[#allocation2 + $0x110] ss:$8 sps:$4 sm:$0xff]   ;;  %v1161_v4 = vld [vmem:[#allocation2 + $0x124] ss:$8 sps:$4 sm:$0xff]  }
  0x14   :  { %695 = vmatpush1.bf16.msra.mxu0 %v1157_v1  ;;  %v1163_v5 = vld [vmem:[#allocation2 + $0x120] ss:$8 sps:$4 sm:$0xff]   ;;  %v1164_v6 = vld [vmem:[#allocation2 + $0x134] ss:$8 sps:$4 sm:$0xff]   ;;  %v1166_v7 = vld [vmem:[#allocation2 + $0x130] ss:$8 sps:$4 sm:$0xff]  }
  0x15   :  { %696 = vmatprep.subr.bf16.mxu0 %v1158_v2  ;;  %v1167_v8 = vld [vmem:[#allocation2 + $0x144] ss:$8 sps:$4 sm:$0xff]   ;;  %v1169_v9 = vld [vmem:[#allocation2 + $0x140] ss:$8 sps:$4 sm:$0xff]   ;;  %v1170_v10 = vld [vmem:[#allocation2 + $0x154] ss:$8 sps:$4 sm:$0xff]  }
  0x16   :  { %v1172_v11 = vld [vmem:[#allocation2 + $0x150] ss:$8 sps:$4 sm:$0xff]   ;;  %v1197_v12 = vld [vmem:[#allocation2 + $0x4] ss:$8 sps:$4 sm:$0xff]   ;;  %v1199_v13 = vld [vmem:[#allocation2] ss:$8 sps:$4 sm:$0xff]  }
  0x17   :  { %v1173_v14 = vld [vmem:[#allocation2 + $0x164] ss:$8 sps:$4 sm:$0xff]   ;;  %653 = vmatprep.subr.bf16.mxu1 %v1197_v12  ;;  %v1203_v15 = vld [vmem:[#allocation2 + $0x14] ss:$8 sps:$4 sm:$0xff]   ;;  %v1205_v16 = vld [vmem:[#allocation2 + $0x10] ss:$8 sps:$4 sm:$0xff]  }
  0x18   :  { %697 = vmatpush1.bf16.msra.mxu0 %v1160_v3  ;;  %654 = vmatpush1.bf16.msra.mxu1 %v1199_v13  ;;  %v1175_v17 = vld [vmem:[#allocation2 + $0x160] ss:$8 sps:$4 sm:$0xff]   ;;  %v1176_v18 = vld [vmem:[#allocation2 + $0x174] ss:$8 sps:$4 sm:$0xff]   ;;  %v1209_v19 = vld [vmem:[#allocation2 + $0x24] ss:$8 sps:$4 sm:$0xff]  }
  0x19   :  { %698 = vmatprep.subr.bf16.mxu0 %v1161_v4  ;;  %655 = vmatprep.subr.bf16.mxu1 %v1203_v15  ;;  %v38_v20 = vld [vmem:[%s1466_s0 + $0x18] sm:$0xff]  ;;  %v1211_v21 = vld [vmem:[#allocation2 + $0x20] ss:$8 sps:$4 sm:$0xff]   ;;  %v1179_v24 = vld [vmem:[#allocation2 + $0x184] ss:$8 sps:$4 sm:$0xff]   ;;  %vm649_vm0 = vcmask 130048  }
  0x1a   :  { %v45_v22 = vpack.c.bf16 %v38_v20, %v38_v20  ;;  %v1178_v23 = vld [vmem:[#allocation2 + $0x170] ss:$8 sps:$4 sm:$0xff]   ;;  %v1215_v25 = vld [vmem:[#allocation2 + $0x34] ss:$8 sps:$4 sm:$0xff]   ;;  %v1181_v26 = vld [vmem:[#allocation2 + $0x180] ss:$8 sps:$4 sm:$0xff]  }
  0x1b   :  { %v1217_v27 = vld [vmem:[#allocation2 + $0x30] ss:$8 sps:$4 sm:$0xff]   ;;  %v1221_v28 = vld [vmem:[#allocation2 + $0x44] ss:$8 sps:$4 sm:$0xff]   ;;  %v1182_v29 = vld [vmem:[#allocation2 + $0x194] ss:$8 sps:$4 sm:$0xff]  }
  0x1c   :  { %699 = vmatpush1.bf16.msra.mxu0 %v1163_v5  ;;  %656 = vmatpush1.bf16.msra.mxu1 %v1205_v16  ;;  %v1184_v30 = vld [vmem:[#allocation2 + $0x190] ss:$8 sps:$4 sm:$0xff]   ;;  %v1223_v31 = vld [vmem:[#allocation2 + $0x40] ss:$8 sps:$4 sm:$0xff]   ;;  %v1227_v32 = vld [vmem:[#allocation2 + $0x54] ss:$8 sps:$4 sm:$0xff]  }
  0x1d   :  { %700 = vmatprep.subr.bf16.mxu0 %v1164_v6  ;;  %657 = vmatprep.subr.bf16.mxu1 %v1209_v19  ;;  %v1185_v33 = vld [vmem:[#allocation2 + $0x1a4] ss:$8 sps:$4 sm:$0xff]   ;;  %v1187_v34 = vld [vmem:[#allocation2 + $0x1a0] ss:$8 sps:$4 sm:$0xff]   ;;  %v1229_v35 = vld [vmem:[#allocation2 + $0x50] ss:$8 sps:$4 sm:$0xff]  }
  0x1e   :  { %726 = vmatprep.mubr.bf16.mxu0 %v45_v22  ;;  %v1233_v36 = vld [vmem:[#allocation2 + $0x64] ss:$8 sps:$4 sm:$0xff]   ;;  %v1188_v37 = vld [vmem:[#allocation2 + $0x1b4] ss:$8 sps:$4 sm:$0xff]   ;;  %v1190_v38 = vld [vmem:[#allocation2 + $0x1b0] ss:$8 sps:$4 sm:$0xff]  }
  0x1f   :  { %v1235_v39 = vld [vmem:[#allocation2 + $0x60] ss:$8 sps:$4 sm:$0xff]   ;;  %v1239_v40 = vld [vmem:[#allocation2 + $0x74] ss:$8 sps:$4 sm:$0xff]   ;;  %v1191_v41 = vld [vmem:[#allocation2 + $0x1c4] ss:$8 sps:$4 sm:$0xff]  }
  0x20   :  { %701 = vmatpush1.bf16.msra.mxu0 %v1166_v7  ;;  %658 = vmatpush1.bf16.msra.mxu1 %v1211_v21  ;;  %v1193_v42 = vld [vmem:[#allocation2 + $0x1c0] ss:$8 sps:$4 sm:$0xff]   ;;  %v1241_v43 = vld [vmem:[#allocation2 + $0x70] ss:$8 sps:$4 sm:$0xff]   ;;  %v1245_v44 = vld [vmem:[#allocation2 + $0x84] ss:$8 sps:$4 sm:$0xff]  }
  0x21   :  { %702 = vmatprep.subr.bf16.mxu0 %v1167_v8  ;;  %659 = vmatprep.subr.bf16.mxu1 %v1215_v25  ;;  %v1194_v45 = vld [vmem:[#allocation2 + $0x1d4] ss:$8 sps:$4 sm:$0xff]   ;;  %v1196_v46 = vld [vmem:[#allocation2 + $0x1d0] ss:$8 sps:$4 sm:$0xff]   ;;  %v1247_v47 = vld [vmem:[#allocation2 + $0x80] ss:$8 sps:$4 sm:$0xff]  }
  0x22   :  { %v1251_v48 = vld [vmem:[#allocation2 + $0x94] ss:$8 sps:$4 sm:$0xff]   ;;  %v1200_v49 = vld [vmem:[#allocation2 + $0x1e4] ss:$8 sps:$4 sm:$0xff]   ;;  %v1202_v50 = vld [vmem:[#allocation2 + $0x1e0] ss:$8 sps:$4 sm:$0xff]  }
  0x23   :  { %v1253_v51 = vld [vmem:[#allocation2 + $0x90] ss:$8 sps:$4 sm:$0xff]   ;;  %v1257_v52 = vld [vmem:[#allocation2 + $0xa4] ss:$8 sps:$4 sm:$0xff]   ;;  %v1206_v53 = vld [vmem:[#allocation2 + $0x1f4] ss:$8 sps:$4 sm:$0xff]  }
  0x24   :  { %703 = vmatpush1.bf16.msra.mxu0 %v1169_v9  ;;  %660 = vmatpush1.bf16.msra.mxu1 %v1217_v27  ;;  %v1208_v54 = vld [vmem:[#allocation2 + $0x1f0] ss:$8 sps:$4 sm:$0xff]   ;;  %v1259_v56 = vld [vmem:[#allocation2 + $0xa0] ss:$8 sps:$4 sm:$0xff]   ;;  %v1263_v57 = vld [vmem:[#allocation2 + $0xb4] ss:$8 sps:$4 sm:$0xff]  }
  0x25   :  { %704 = vmatprep.subr.bf16.mxu0 %v1170_v10  ;;  %661 = vmatprep.subr.bf16.mxu1 %v1221_v28  ;;  %v37_v55 = vld [vmem:[%s1466_s0 + $0x10] sm:$0xff]  ;;  %v1214_v58 = vld [vmem:[#allocation2 + $0x204] ss:$8 sps:$4 sm:$0xff]   ;;  %v1212_v62 = vld [vmem:[#allocation2 + $0x200] ss:$8 sps:$4 sm:$0xff]   ;;  %vm996_vm1 = vcmask 15360  }
  0x26   :  { %v44_v59 = vpack.c.bf16 %v37_v55, %v37_v55  ;;  %v1265_v60 = vld [vmem:[#allocation2 + $0xb0] ss:$8 sps:$4 sm:$0xff]   ;;  %v36_v61 = vld [vmem:[%s1466_s0 + $0x8] sm:$0xff]  ;;  %v1220_v1 = vld [vmem:[#allocation2 + $0x214] ss:$8 sps:$4 sm:$0xff]  }
  0x27   :  { %v1269_v63 = vld [vmem:[#allocation2 + $0xc4] ss:$8 sps:$4 sm:$0xff]   ;;  %v43_v0 = vpack.c.bf16 %v36_v61, %v36_v61  ;;  %v1271_v2 = vld [vmem:[#allocation2 + $0xc0] ss:$8 sps:$4 sm:$0xff]   ;;  %v1218_v4 = vld [vmem:[#allocation2 + $0x210] ss:$8 sps:$4 sm:$0xff]  }
  0x28   :  { %705 = vmatpush1.bf16.msra.mxu0 %v1172_v11  ;;  %662 = vmatpush1.bf16.msra.mxu1 %v1223_v31  ;;  %v40_v3 = vld [vmem:[%s1466_s0 + $0x28] sm:$0xff]  ;;  %v1275_v5 = vld [vmem:[#allocation2 + $0xd4] ss:$8 sps:$4 sm:$0xff]   ;;  %v1277_v9 = vld [vmem:[#allocation2 + $0xd0] ss:$8 sps:$4 sm:$0xff]  }
  0x29   :  { %706 = vmatprep.subr.bf16.mxu0 %v1173_v14  ;;  %663 = vmatprep.subr.bf16.mxu1 %v1227_v32  ;;  %v47_v6 = vpack.c.bf16 %v40_v3, %v40_v3  ;;  %v1226_v7 = vld [vmem:[#allocation2 + $0x224] ss:$8 sps:$4 sm:$0xff]   ;;  %v1224_v8 = vld [vmem:[#allocation2 + $0x220] ss:$8 sps:$4 sm:$0xff]   ;;  %v1232_v11 = vld [vmem:[#allocation2 + $0x234] ss:$8 sps:$4 sm:$0xff]  }
  0x2a   :  { %685 = vmatprep.mubr.bf16.mxu1 %v43_v0  ;;  %v1281_v10 = vld [vmem:[#allocation2 + $0xe4] ss:$8 sps:$4 sm:$0xff]   ;;  %v1230_v12 = vld [vmem:[#allocation2 + $0x230] ss:$8 sps:$4 sm:$0xff]   ;;  %v1283_v13 = vld [vmem:[#allocation2 + $0xe0] ss:$8 sps:$4 sm:$0xff]  }
  0x2b   :  { %v1287_v14 = vld [vmem:[#allocation2 + $0xf4] ss:$8 sps:$4 sm:$0xff]   ;;  %v1238_v15 = vld [vmem:[#allocation2 + $0x244] ss:$8 sps:$4 sm:$0xff]   ;;  %v1289_v16 = vld [vmem:[#allocation2 + $0xf0] ss:$8 sps:$4 sm:$0xff]  }
  0x2c   :  { %707 = vmatpush1.bf16.msra.mxu0 %v1175_v17  ;;  %664 = vmatpush1.bf16.msra.mxu1 %v1229_v35  ;;  %v35_v17 = vld [vmem:[%s1466_s0] sm:$0xff]  ;;  %v1244_v20 = vld [vmem:[#allocation2 + $0x254] ss:$8 sps:$4 sm:$0xff]   ;;  %v1254_v32 = vld [vmem:[#allocation2 + $0x270] ss:$8 sps:$4 sm:$0xff]  }
  0x2d   :  { %708 = vmatprep.subr.bf16.mxu0 %v1176_v18  ;;  %665 = vmatprep.subr.bf16.mxu1 %v1233_v36  ;;  %v1236_v18 = vld [vmem:[#allocation2 + $0x240] ss:$8 sps:$4 sm:$0xff]   ;;  %v1298_v19 = vld [vmem:[#allocation2 + $0x304] ss:$8 sps:$4 sm:$0xff]   ;;  %v42_v21 = vpack.c.bf16 %v35_v17, %v35_v17  ;;  %v41_v27 = vld [vmem:[%s1466_s0 + $0x30] sm:$0xff] }
  0x2e   :  { %v1296_v22 = vld [vmem:[#allocation2 + $0x300] ss:$8 sps:$4 sm:$0xff]   ;;  %v1250_v25 = vld [vmem:[#allocation2 + $0x264] ss:$8 sps:$4 sm:$0xff]   ;;  %v1308_v55 = vld [vmem:[%s1469_s3 + $0x58] sm:$0xff]  }
  0x2f   :  { %v1248_v28 = vld [vmem:[#allocation2 + $0x260] ss:$8 sps:$4 sm:$0xff]   ;;  %v1314_v61 = vld [vmem:[%s1469_s3 + $0x70] sm:$0xff]   ;;  %v1317_v0 = vld [vmem:[%s1469_s3 + $0x38] sm:$0xff]  }
  0x30   :  { %709 = vmatpush1.bf16.msra.mxu0 %v1178_v23  ;;  %666 = vmatpush1.bf16.msra.mxu1 %v1235_v39  ;;  %v1242_v23 = vld [vmem:[#allocation2 + $0x250] ss:$8 sps:$4 sm:$0xff]   ;;  %v1303_v31 = vld [vmem:[%s1469_s3] sm:$0xff]   ;;  %v1305_v35 = vld [vmem:[%s1469_s3 + $0x8] sm:$0xff]  }
  0x31   :  { %710 = vmatprep.subr.bf16.mxu0 %v1179_v24  ;;  %667 = vmatprep.subr.bf16.mxu1 %v1239_v40  ;;  %v1302_v24 = vld [vmem:[%s1469_s3 + $0x40] sm:$0xff]   ;;  %v1307_v39 = vld [vmem:[%s1469_s3 + $0x10] sm:$0xff]  }
  0x32   :  { %v1260_v36 = vld [vmem:[#allocation2 + $0x280] ss:$8 sps:$4 sm:$0xff]   ;;  %v1266_v40 = vld [vmem:[#allocation2 + $0x290] ss:$8 sps:$4 sm:$0xff]  }
  0x34   :  { %711 = vmatpush1.bf16.msra.mxu0 %v1181_v26  ;;  %668 = vmatpush1.bf16.msra.mxu1 %v1241_v43  ;;  %v1345_v26 = vmov 0   ;;  %v1280_v43 = vld [vmem:[#allocation2 + $0x2b4] ss:$8 sps:$4 sm:$0xff]  }
  0x35   :  { %712 = vmatprep.subr.bf16.mxu0 %v1182_v29  ;;  %669 = vmatprep.subr.bf16.mxu1 %v1245_v44  ;;  %v1256_v29 = vld [vmem:[#allocation2 + $0x274] ss:$8 sps:$4 sm:$0xff]   ;;  %v1278_v44 = vld [vmem:[#allocation2 + $0x2b0] ss:$8 sps:$4 sm:$0xff]  }
  0x38   :  { %713 = vmatpush1.bf16.msra.mxu0 %v1184_v30  ;;  %670 = vmatpush1.bf16.msra.mxu1 %v1247_v47  ;;  %v48_v30 = vpack.c.bf16 %v41_v27, %v41_v27  ;;  %v1292_v47 = vld [vmem:[#allocation2 + $0x2d4] ss:$8 sps:$4 sm:$0xff]  }
  0x39   :  { %714 = vmatprep.subr.bf16.mxu0 %v1185_v33  ;;  %671 = vmatprep.subr.bf16.mxu1 %v1251_v48  ;;  %v1304_v33 = vld [vmem:[%s1469_s3 + $0x48] sm:$0xff]   ;;  %v1290_v48 = vld [vmem:[#allocation2 + $0x2d0] ss:$8 sps:$4 sm:$0xff]  }
  0x3c   :  { %715 = vmatpush1.bf16.msra.mxu0 %v1187_v34  ;;  %672 = vmatpush1.bf16.msra.mxu1 %v1253_v51  ;;  %v1262_v34 = vld [vmem:[#allocation2 + $0x284] ss:$8 sps:$4 sm:$0xff]   ;;  %v1301_v51 = vld [vmem:[#allocation2 + $0x2f4] ss:$8 sps:$4 sm:$0xff]  }
  0x3d   :  { %716 = vmatprep.subr.bf16.mxu0 %v1188_v37  ;;  %673 = vmatprep.subr.bf16.mxu1 %v1257_v52  ;;  %v1306_v37 = vld [vmem:[%s1469_s3 + $0x50] sm:$0xff]  }
  0x3e   :  { %v1299_v52 = vld [vmem:[#allocation2 + $0x2f0] ss:$8 sps:$4 sm:$0xff]  }
  0x40   :  { %717 = vmatpush1.bf16.msra.mxu0 %v1190_v38  ;;  %674 = vmatpush1.bf16.msra.mxu1 %v1259_v56  ;;  %v1268_v38 = vld [vmem:[#allocation2 + $0x294] ss:$8 sps:$4 sm:$0xff]  }
  0x41   :  { %718 = vmatprep.subr.bf16.mxu0 %v1191_v41  ;;  %675 = vmatprep.subr.bf16.mxu1 %v1263_v57  ;;  %v1274_v41 = vld [vmem:[#allocation2 + $0x2a4] ss:$8 sps:$4 sm:$0xff]   ;;  %v1309_v56 = vld [vmem:[%s1469_s3 + $0x18] sm:$0xff]  }
  0x42   :  { %v1310_v57 = vld [vmem:[%s1469_s3 + $0x60] sm:$0xff]  }
  0x44   :  { %719 = vmatpush1.bf16.msra.mxu0 %v1193_v42  ;;  %676 = vmatpush1.bf16.msra.mxu1 %v1265_v60  ;;  %v1272_v42 = vld [vmem:[#allocation2 + $0x2a0] ss:$8 sps:$4 sm:$0xff]  }
  0x45   :  { %720 = vmatprep.subr.bf16.mxu0 %v1194_v45  ;;  %677 = vmatprep.subr.bf16.mxu1 %v1269_v63  ;;  %v1286_v45 = vld [vmem:[#allocation2 + $0x2c4] ss:$8 sps:$4 sm:$0xff]   ;;  %v1316_v63 = vld [vmem:[%s1469_s3 + $0x78] sm:$0xff]  }
  0x46   :  { %v1313_v60 = vld [vmem:[%s1469_s3 + $0x28] sm:$0xff]  }
  0x48   :  { %721 = vmatpush1.bf16.msra.mxu0 %v1196_v46  ;;  %678 = vmatpush1.bf16.msra.mxu1 %v1271_v2  ;;  %v1284_v46 = vld [vmem:[#allocation2 + $0x2c0] ss:$8 sps:$4 sm:$0xff]  }
  0x49   :  { %722 = vmatprep.subr.bf16.mxu0 %v1200_v49  ;;  %679 = vmatprep.subr.bf16.mxu1 %v1275_v5  ;;  %v1295_v49 = vld [vmem:[#allocation2 + $0x2e4] ss:$8 sps:$4 sm:$0xff]  }
  0x4c   :  { %723 = vmatpush1.bf16.msra.mxu0 %v1202_v50  ;;  %680 = vmatpush1.bf16.msra.mxu1 %v1277_v9  ;;  %v1293_v50 = vld [vmem:[#allocation2 + $0x2e0] ss:$8 sps:$4 sm:$0xff]   ;;  %v149_v9 = vlaneseq }
  0x4d   :  { %724 = vmatprep.subr.bf16.mxu0 %v1206_v53  ;;  %681 = vmatprep.subr.bf16.mxu1 %v1281_v10  ;;  %v39_v53 = vld [vmem:[%s1466_s0 + $0x20] sm:$0xff] }
  0x4e   :  { %v150_v10 = vshrl.u32 %v149_v9, 7 }
  0x50   :  { %725 = vmatpush1.bf16.msra.mxu0 %v1208_v54  ;;  %682 = vmatpush1.bf16.msra.mxu1 %v1283_v13  ;;  %v46_v54 = vpack.c.bf16 %v39_v53, %v39_v53  ;;  %v155_v13 = vsub.s32 1, %v150_v10 }
  0x51   :  { %735 = vmatprep.subr.bf16.mxu0 %v1214_v58  ;;  %683 = vmatprep.subr.bf16.mxu1 %v1287_v14  ;;  %v1311_v58 = vld [vmem:[%s1469_s3 + $0x20] sm:$0xff]  }
  0x53   :  { %727 = vmatmul.mubr.bf16.vlgmr.msra.gmra.mrb[0].mxu0 %v44_v59  ;;  %v1312_v59 = vld [vmem:[%s1469_s3 + $0x68] sm:$0xff]  }
  0x54   :  { %736 = vmatpush1.bf16.msra.mxu0 %v1212_v62  ;;  %767 = vmatprep.mubr.bf16.mxu0 %v47_v6  ;;  %v1315_v62 = vld [vmem:[%s1469_s3 + $0x30] sm:$0xff]  }
  0x55   :  { %737 = vmatprep.subr.bf16.mxu0 %v1220_v1  ;;  %684 = vmatpush1.bf16.msra.mxu1 %v1289_v16 }
  0x56   :  { %776 = vmatprep.subr.bf16.mxu1 %v1298_v19 }
  0x58   :  { %738 = vmatpush1.bf16.msra.mxu0 %v1218_v4  ;;  %686 = vmatmul.mubr.bf16.vlgmr.msra.gmra.mrb[0].mxu1 %v42_v21 }
  0x59   :  { %739 = vmatprep.subr.bf16.mxu0 %v1226_v7  ;;  %777 = vmatpush1.bf16.msra.mxu1 %v1296_v22 }
  0x5a   :  { %808 = vmatprep.mubr.bf16.mxu1 %v1345_v26  ;;  %1119 = vmatprep.subr.bf16.mxu1 %v1302_v24 }
  0x5c   :  { %740 = vmatpush1.bf16.msra.mxu0 %v1224_v8 }
  0x5d   :  { %741 = vmatprep.subr.bf16.mxu0 %v1232_v11  ;;  %v151_v11 = vsub.s32 0, %v150_v10 }
  0x60   :  { %742 = vmatpush1.bf16.msra.mxu0 %v1230_v12  ;;  %1101 = vmatmul.mubr.msk.bf16.vlgmr.msra.gmra.mrb[4].mxu1 %vm649_vm0, %v48_v30  ;;  %v147_v12 = vld [vmem:[%s1468_s2] sm:$0x3] }
  0x61   :  { %743 = vmatprep.subr.bf16.mxu0 %v1238_v15  ;;  %1120 = vmatpush3.bf16.msra.mxu1 %v1303_v31  ;;  %v152_v14 = vrot.slane %v147_v12, %v151_v11  ;;  %v156_v15 = vrot.slane %v147_v12, %v155_v13  ;;  %v1102_v31 = vld [vmem:[%s1470_s4] ss:$0 sm:$0xff] }
  0x62   :  { %1121 = vmatprep.subr.bf16.mxu1 %v1304_v33 }
  0x64   :  { %744 = vmatpush1.bf16.msra.mxu0 %v1236_v18 }
  0x65   :  { %745 = vmatprep.subr.bf16.mxu0 %v1244_v20  ;;  %1122 = vmatpush3.bf16.msra.mxu1 %v1305_v35 }
  0x66   :  { %1123 = vmatprep.subr.bf16.mxu1 %v1306_v37 }
  0x68   :  { %746 = vmatpush1.bf16.msra.mxu0 %v1242_v23 }
  0x69   :  { %747 = vmatprep.subr.bf16.mxu0 %v1250_v25  ;;  %1124 = vmatpush3.bf16.msra.mxu1 %v1307_v39 }
  0x6a   :  { %1125 = vmatprep.subr.bf16.mxu1 %v1308_v55 }
  0x6c   :  { %748 = vmatpush1.bf16.msra.mxu0 %v1248_v28 }
  0x6d   :  { %749 = vmatprep.subr.bf16.mxu0 %v1256_v29  ;;  %1126 = vmatpush3.bf16.msra.mxu1 %v1309_v56 }
  0x6e   :  { %1127 = vmatprep.subr.bf16.mxu1 %v1310_v57 }
  0x70   :  { %750 = vmatpush1.bf16.msra.mxu0 %v1254_v32 }
  0x71   :  { %751 = vmatprep.subr.bf16.mxu0 %v1262_v34  ;;  %1128 = vmatpush3.bf16.msra.mxu1 %v1311_v58 }
  0x72   :  { %1129 = vmatprep.subr.bf16.mxu1 %v1312_v59 }
  0x74   :  { %752 = vmatpush1.bf16.msra.mxu0 %v1260_v36 }
  0x75   :  { %753 = vmatprep.subr.bf16.mxu0 %v1268_v38  ;;  %1130 = vmatpush3.bf16.msra.mxu1 %v1313_v60 }
  0x76   :  { %1131 = vmatprep.subr.bf16.mxu1 %v1314_v61 }
  0x78   :  { %754 = vmatpush1.bf16.msra.mxu0 %v1266_v40 }
  0x79   :  { %755 = vmatprep.subr.bf16.mxu0 %v1274_v41  ;;  %1132 = vmatpush3.bf16.msra.mxu1 %v1315_v62 }
  0x7a   :  { %1133 = vmatprep.subr.bf16.mxu1 %v1316_v63 }
  0x7c   :  { %756 = vmatpush1.bf16.msra.mxu0 %v1272_v42 }
  0x7d   :  { %757 = vmatprep.subr.bf16.mxu0 %v1280_v43  ;;  %1134 = vmatpush3.bf16.msra.mxu1 %v1317_v0 }
  0x80   :  { %758 = vmatpush1.bf16.msra.mxu0 %v1278_v44 }
  0x81   :  { %759 = vmatprep.subr.bf16.mxu0 %v1286_v45 }
  0x84   :  { %760 = vmatpush1.bf16.msra.mxu0 %v1284_v46 }
  0x85   :  { %761 = vmatprep.subr.bf16.mxu0 %v1292_v47 }
  0x88   :  { %762 = vmatpush1.bf16.msra.mxu0 %v1290_v48 }
  0x89   :  { %763 = vmatprep.subr.bf16.mxu0 %v1295_v49 }
  0x8c   :  { %764 = vmatpush1.bf16.msra.mxu0 %v1293_v50 }
  0x8d   :  { %765 = vmatprep.subr.bf16.mxu0 %v1301_v51 }
  0x90   :  { %766 = vmatpush1.bf16.msra.mxu0 %v1299_v52 }
  0x93   :  { %768 = vmatmul.mubr.bf16.vlgmr.msra.gmra.mrb[0].mxu0 %v46_v54 }
 0x12b   :  { %v687_v1 = vpop.f32.mrb[0].mxu1 }
 0x12c   :  { %v689_v2 = vpop.f32.mrb[1].mxu1  ;;  %v688_v16 = vadd.f32 %v687_v1, %v152_v14 }
 0x12d   :  { %v691_v3 = vpop.f32.mrb[2].mxu1  ;;  %v690_v17 = vadd.f32 %v689_v2, %v156_v15 }
 0x12e   :  { %v692_v4 = vpop.f32.mrb[3].mxu1 }
 0x133   :  { %v810_v5 = vpop.f32.mrb[4].mxu1 }
 0x134   :  { %v812_v6 = vpop.f32.mrb[5].mxu1 }
 0x135   :  { %v814_v7 = vpop.f32.mrb[6].mxu1 }
 0x136   :  { %v815_v8 = vpop.f32.mrb[7].mxu1 }
 0x166   :  { %v769_v18 = vpop.f32.mrb[0].mxu0 }
 0x167   :  { %v1142_v19 = vadd.f32 %v769_v18, %v688_v16  ;;  %v771_v20 = vpop.f32.mrb[1].mxu0 }
 0x168   :  { %v1145_v21 = vadd.f32 %v771_v20, %v690_v17  ;;  %v773_v22 = vpop.f32.mrb[2].mxu0 }
 0x169   :  { %v1143_v23 = vadd.f32 %v1142_v19, %v810_v5  ;;  %v774_v24 = vpop.f32.mrb[3].mxu0 }
 0x16a   :  { %v1146_v25 = vadd.f32 %v1145_v21, %v812_v6 }
 0x16b   :  { %v817_v26 = vmax.f32 %v1143_v23, 0.0 }
 0x16c   :  { %v818_v27 = vmax.f32 %v1146_v25, 0.0 }
 0x16d   :  { %v819_v29 = vpack.c.bf16 %v817_v26, %v817_v26 }
 0x16e   :  { %v820_v28 = vpack.c.bf16 %v818_v27, %v818_v27 }
 0x170   :  { %988 = vmatprep.mubr.bf16.mxu1 %v820_v28 }
 0x171   :  { %989 = vmatmul.mubr.bf16.vlgmr.msra.gmra.mrb[8].mxu1 %v819_v29 }
 0x244   :  { %v1135_v30 = vpop.f32.mrb[8].mxu1 }
 0x245   :  { %v1136_v32 = vpop.f32.mrb[9].mxu1 }
 0x246   :  { %v1137_v33 = vadd.f32 %v1136_v32, %v1135_v30  ;;  %v1138_v34 = vpop.f32.mrb[10].mxu1 }
 0x247   :  { %v1139_v35 = vpop.f32.mrb[11].mxu1 }
 0x248   :  { %v991_v36 = vadd.f32 %v1137_v33, %v1102_v31 }
 0x24a   :  { %997 = vst.msk [vmem:[%s1471_s5] sm:$0xff] %vm996_vm1, %v991_v36 }
 0x24b   :  { %1002 = vsyncpa [#allocation3], 1 }

</bundles_post_ra>
